<compile_context>
chip_gen: v5e
topology: v5e:2x2
jax: 0.10.0
libtpu: 0.0.40
codegen_flags: <defaults>
</compile_context>

<pallas_src>
import functools

import jax
import jax.numpy as jnp
import numpy as np
from jax.experimental import pallas as pl
from jax.experimental.pallas import tpu as pltpu


_VMEM_LIMIT = 32 * 1024 * 1024       # safe scoped-VMEM budget on v5e/v6e/v7x
_MAX_BLOCK_BYTES = 2 * 1024 * 1024   # per-block f32 footprint target (x tile)
_FUSED_MAX_BYTES = 2 * 1024 * 1024   # fused train path: whole half per block


def _pick_hw_tile(hw, c, max_block_bytes=_MAX_BLOCK_BYTES):
    """Lane-axis tile: a multiple of 128 dividing hw with a (c, tile) f32
    block under the byte budget.  Falls back to the full row when hw is not a
    multiple of 128 (a block dim equal to the array dim is always legal)."""
    if hw % 128 != 0:
        return hw
    budget = max(128, (max_block_bytes // (4 * c)) // 128 * 128)
    for cand in (4096, 2048, 1024, 512, 256, 128):
        if cand <= budget and hw % cand == 0:
            return cand
    return 128


# ----------------------------- kernels -------------------------------------


def dsbn_train_fused_kernel(x_ref, g_ref, b_ref, o_ref, *, eps):
    # x block: (1, half, C, HW); g/b block: (1, C, 1).  Single pass: stats +
    # normalize with the whole half resident in VMEM.
    x = x_ref[0].astype(jnp.float32)            # (half, C, HW)
    gamma = g_ref[0].astype(jnp.float32)        # (C, 1)
    beta = b_ref[0].astype(jnp.float32)         # (C, 1)
    inv_n = jnp.float32(1.0 / (x.shape[0] * x.shape[2]))

    # lane (XLU) reduce first, then the cheap leading-axis reduce.
    s = jnp.sum(jnp.sum(x, axis=-1, keepdims=True), axis=0)        # (C, 1)
    sq = jnp.sum(jnp.sum(x * x, axis=-1, keepdims=True), axis=0)   # (C, 1)
    mean = s * inv_n
    var = jnp.maximum(sq * inv_n - mean * mean, 0.0)                # biased var
    scale = jax.lax.rsqrt(var + eps) * gamma                        # (C, 1)
    shift = beta - mean * scale                                     # (C, 1)
    # one FMA per element, broadcast (C,1) over (half, C, HW)
    o_ref[0] = (x * scale + shift).astype(o_ref.dtype)


def dsbn_stats_kernel(x_ref, g_ref, b_ref, scale_ref, shift_ref,
                      sum_sc, sq_sc, *, eps, inv_count):
    # Pass 1 of the tiled path.  Grid = (half_id, batch_in_half, hw_tile);
    # the last two axes are the reduction and are marked "arbitrary".
    j = pl.program_id(1)
    k = pl.program_id(2)

    @pl.when((j == 0) & (k == 0))
    def _():
        sum_sc[...] = jnp.zeros_like(sum_sc)
        sq_sc[...] = jnp.zeros_like(sq_sc)

    x = x_ref[0, 0].astype(jnp.float32)                    # (C, hw_tile)
    sum_sc[...] += jnp.sum(x, axis=-1, keepdims=True)      # (C, 1)
    sq_sc[...] += jnp.sum(x * x, axis=-1, keepdims=True)   # (C, 1)

    @pl.when((j == pl.num_programs(1) - 1) & (k == pl.num_programs(2) - 1))
    def _():
        gamma = g_ref[0].astype(jnp.float32)               # (C, 1)
        beta = b_ref[0].astype(jnp.float32)                # (C, 1)
        mean = sum_sc[...] * inv_count
        var = jnp.maximum(sq_sc[...] * inv_count - mean * mean, 0.0)
        scale = jax.lax.rsqrt(var + eps) * gamma
        scale_ref[0] = scale.astype(scale_ref.dtype)
        shift_ref[0] = (beta - mean * scale).astype(shift_ref.dtype)


def dsbn_normalize_kernel(x_ref, scale_ref, shift_ref, o_ref):
    # Elementwise y = x * scale + shift; per-channel scale/shift broadcast
    # across the lane (H*W) axis.
    x = x_ref[0, 0].astype(jnp.float32)                    # (C, hw_tile)
    scale = scale_ref[0].astype(jnp.float32)               # (C, 1)
    shift = shift_ref[0].astype(jnp.float32)               # (C, 1)
    o_ref[0, 0] = (x * scale + shift).astype(o_ref.dtype)


# ----------------------------- wrappers ------------------------------------


def _normalize_tiled(x4, scale, shift, out_dtype):
    """x4: (G, N, C, HW); scale/shift: (G, C, 1) f32.  Returns x4*scale+shift,
    row-tiled and fully pipelined (all grid axes parallel)."""
    G, N, C, HW = x4.shape
    hw_tile = _pick_hw_tile(HW, C)
    n_hwt = HW // hw_tile
    return pl.pallas_call(
        dsbn_normalize_kernel,
        out_shape=jax.ShapeDtypeStruct((G, N, C, HW), out_dtype),
        grid_spec=pltpu.PrefetchScalarGridSpec(
            num_scalar_prefetch=0,
            grid=(G, N, n_hwt),
            in_specs=[
                pl.BlockSpec((1, 1, C, hw_tile), lambda i, j, k: (i, j, 0, k)),
                pl.BlockSpec((1, C, 1), lambda i, j, k: (i, 0, 0)),
                pl.BlockSpec((1, C, 1), lambda i, j, k: (i, 0, 0)),
            ],
            out_specs=pl.BlockSpec((1, 1, C, hw_tile),
                                   lambda i, j, k: (i, j, 0, k)),
        ),
        compiler_params=pltpu.CompilerParams(
            dimension_semantics=("parallel", "parallel", "parallel"),
            vmem_limit_bytes=_VMEM_LIMIT),
    )(x4, scale, shift)


def ds_batchnorm_train(x, gamma_stack, beta_stack, eps=1e-5,
                       force_two_pass=False):
    """x: (B, C, H, W) NCHW.  gamma_stack/beta_stack: (2, C) for dsbn1/dsbn2."""
    B, C, H, W = x.shape
    assert B % 2 == 0, f"error batch size {B}"
    half = B // 2
    HW = H * W

    x4 = x.reshape(2, half, C, HW)           # free reshape, no transpose
    g = gamma_stack.astype(jnp.float32).reshape(2, C, 1)
    b = beta_stack.astype(jnp.float32).reshape(2, C, 1)

    half_bytes = half * C * HW * 4
    if (not force_two_pass) and half_bytes <= _FUSED_MAX_BYTES:
        # Small-activation fast path: whole half resident, 1 read + 1 write.
        out = pl.pallas_call(
            functools.partial(dsbn_train_fused_kernel, eps=eps),
            out_shape=jax.ShapeDtypeStruct((2, half, C, HW), x.dtype),
            grid_spec=pltpu.PrefetchScalarGridSpec(
                num_scalar_prefetch=0,
                grid=(2,),
                in_specs=[
                    pl.BlockSpec((1, half, C, HW), lambda i: (i, 0, 0, 0)),
                    pl.BlockSpec((1, C, 1), lambda i: (i, 0, 0)),
                    pl.BlockSpec((1, C, 1), lambda i: (i, 0, 0)),
                ],
                out_specs=pl.BlockSpec((1, half, C, HW),
                                       lambda i: (i, 0, 0, 0)),
            ),
            compiler_params=pltpu.CompilerParams(
                dimension_semantics=("parallel",),
                vmem_limit_bytes=_VMEM_LIMIT),
        )(x4, g, b)
        return out.reshape(B, C, H, W)

    # General path: tiled two-pass (stats -> normalize), scales to any size.
    hw_tile = _pick_hw_tile(HW, C)
    n_hwt = HW // hw_tile
    inv_count = 1.0 / float(half * HW)

    scale, shift = pl.pallas_call(
        functools.partial(dsbn_stats_kernel, eps=eps, inv_count=inv_count),
        out_shape=(jax.ShapeDtypeStruct((2, C, 1), jnp.float32),
                   jax.ShapeDtypeStruct((2, C, 1), jnp.float32)),
        grid_spec=pltpu.PrefetchScalarGridSpec(
            num_scalar_prefetch=0,
            grid=(2, half, n_hwt),
            in_specs=[
                pl.BlockSpec((1, 1, C, hw_tile), lambda i, j, k: (i, j, 0, k)),
                pl.BlockSpec((1, C, 1), lambda i, j, k: (i, 0, 0)),
                pl.BlockSpec((1, C, 1), lambda i, j, k: (i, 0, 0)),
            ],
            out_specs=[
                pl.BlockSpec((1, C, 1), lambda i, j, k: (i, 0, 0)),
                pl.BlockSpec((1, C, 1), lambda i, j, k: (i, 0, 0)),
            ],
            scratch_shapes=[pltpu.VMEM((C, 1), jnp.float32),
                            pltpu.VMEM((C, 1), jnp.float32)],
        ),
        compiler_params=pltpu.CompilerParams(
            dimension_semantics=("parallel", "arbitrary", "arbitrary"),
            vmem_limit_bytes=_VMEM_LIMIT),
    )(x4, g, b)

    out = _normalize_tiled(x4, scale, shift, x.dtype)
    return out.reshape(B, C, H, W)


def ds_batchnorm_eval(x, gamma1, beta1, running_mean, running_var, eps=1e-5):
    """Eval path: whole batch through dsbn1 with its running statistics."""
    B, C, H, W = x.shape
    HW = H * W
    inv = jax.lax.rsqrt(running_var.astype(jnp.float32) + eps)
    scale = (gamma1.astype(jnp.float32) * inv).reshape(1, C, 1)
    shift = (beta1.astype(jnp.float32)
             - running_mean.astype(jnp.float32)
             * gamma1.astype(jnp.float32) * inv).reshape(1, C, 1)
    x4 = x.reshape(1, B, C, HW)
    out = _normalize_tiled(x4, scale, shift, x.dtype)
    return out.reshape(B, C, H, W)


# ----------------------------- references ----------------------------------


def _bn_ref(xh, g, b, eps):
    mean = xh.mean(axis=(0, 2, 3), keepdims=True)
    var = jnp.square(xh - mean).mean(axis=(0, 2, 3), keepdims=True)
    return (xh - mean) / jnp.sqrt(var + eps) * g.reshape(1, -1, 1, 1) \
        + b.reshape(1, -1, 1, 1)


def ref_train(x, gamma_stack, beta_stack, eps=1e-5):
    half = x.shape[0] // 2
    y0 = _bn_ref(x[:half], gamma_stack[0], beta_stack[0], eps)
    y1 = _bn_ref(x[half:], gamma_stack[1], beta_stack[1], eps)
    return jnp.concatenate([y0, y1], axis=0)


def ref_eval(x, g, b, rm, rv, eps=1e-5):
    return (x - rm.reshape(1, -1, 1, 1)) / jnp.sqrt(rv.reshape(1, -1, 1, 1) + eps) \
        * g.reshape(1, -1, 1, 1) + b.reshape(1, -1, 1, 1)


# ----------------------------- main ----------------------------------------

if __name__ == "__main__":
    B, C, H, W = 2, 4, 16, 16
    eps = 1e-5

    key = jax.random.PRNGKey(0)
    x = jax.random.normal(key, (B, C, H, W), dtype=jnp.float32)

    # Deterministic parameter init (dsbn1 / dsbn2 affine params, non-trivial).
    gamma1 = 1.0 + 0.10 * jnp.arange(C, dtype=jnp.float32)
    beta1 = 0.05 * jnp.arange(C, dtype=jnp.float32)
    gamma2 = 1.0 - 0.05 * jnp.arange(C, dtype=jnp.float32)
    beta2 = -0.02 * jnp.arange(C, dtype=jnp.float32)
    gamma_stack = jnp.stack([gamma1, gamma2], axis=0)   # (2, C)
    beta_stack = jnp.stack([beta1, beta2], axis=0)      # (2, C)

    # dsbn1 running stats at their BatchNorm2d init values.
    running_mean = jnp.zeros((C,), dtype=jnp.float32)
    running_var = jnp.ones((C,), dtype=jnp.float32)

    y_train_ref = ref_train(x, gamma_stack, beta_stack, eps=eps)

    # --- training-mode forward: fused small-activation fast path ---
    y_fused = jax.block_until_ready(
        ds_batchnorm_train(x, gamma_stack, beta_stack, eps=eps))
    np.testing.assert_allclose(np.asarray(y_fused), np.asarray(y_train_ref),
                               rtol=1e-5, atol=1e-4)

    # --- training-mode forward: tiled two-pass path (large-activation path) ---
    y_tiled = jax.block_until_ready(
        ds_batchnorm_train(x, gamma_stack, beta_stack, eps=eps,
                           force_two_pass=True))
    np.testing.assert_allclose(np.asarray(y_tiled), np.asarray(y_train_ref),
                               rtol=1e-5, atol=1e-4)

    # --- eval-mode forward (dsbn1 running stats on the whole batch) ---
    y_eval = jax.block_until_ready(
        ds_batchnorm_eval(x, gamma1, beta1, running_mean, running_var, eps=eps))
    y_eval_ref = ref_eval(x, gamma1, beta1, running_mean, running_var, eps=eps)
    np.testing.assert_allclose(np.asarray(y_eval), np.asarray(y_eval_ref),
                               rtol=1e-5, atol=1e-4)

    print("KERNEL_OK")
</pallas_src>

<mosaic_0001>
module attributes {stable_mosaic.version = 11 : i64} {
  func.func @dsbn_train_fused_kernel(%arg0: i32, %arg1: memref<1x1x4x256xf32, #tpu.memory_space<vmem>>, %arg2: memref<1x4x1xf32, #tpu.memory_space<vmem>>, %arg3: memref<1x4x1xf32, #tpu.memory_space<vmem>>, %arg4: memref<1x1x4x256xf32, #tpu.memory_space<vmem>>) attributes {dimension_semantics = [#tpu.dimension_semantics<parallel>], iteration_bounds = array<i64: 2>, scalar_prefetch = 0 : i64, scratch_operands = 0 : i64, tpu.core_type = #tpu.core_type<tc>, window_params = [{transform_indices = @transform_0, window_bounds = array<i64: 1, 1, 4, 256>}, {transform_indices = @transform_1, window_bounds = array<i64: 1, 4, 1>}, {transform_indices = @transform_2, window_bounds = array<i64: 1, 4, 1>}, {transform_indices = @transform_3, window_bounds = array<i64: 1, 1, 4, 256>}]} {
    %c0 = arith.constant 0 : index
    %c0_0 = arith.constant 0 : index
    %c0_1 = arith.constant 0 : index
    %c0_2 = arith.constant 0 : index
    %0 = vector.load %arg1[%c0, %c0_0, %c0_1, %c0_2] : memref<1x1x4x256xf32, #tpu.memory_space<vmem>>, vector<1x1x4x256xf32>
    %1 = vector.shape_cast %0 : vector<1x1x4x256xf32> to vector<1x4x256xf32>
    %c0_3 = arith.constant 0 : index
    %c0_4 = arith.constant 0 : index
    %c0_5 = arith.constant 0 : index
    %2 = vector.load %arg2[%c0_3, %c0_4, %c0_5] : memref<1x4x1xf32, #tpu.memory_space<vmem>>, vector<1x4x1xf32>
    %3 = vector.shape_cast %2 : vector<1x4x1xf32> to vector<4x1xf32>
    %c0_6 = arith.constant 0 : index
    %c0_7 = arith.constant 0 : index
    %c0_8 = arith.constant 0 : index
    %4 = vector.load %arg3[%c0_6, %c0_7, %c0_8] : memref<1x4x1xf32, #tpu.memory_space<vmem>>, vector<1x4x1xf32>
    %5 = vector.shape_cast %4 : vector<1x4x1xf32> to vector<4x1xf32>
    %cst = arith.constant dense<0.000000e+00> : vector<1x4xf32>
    %6 = vector.multi_reduction <add>, %1, %cst [2] : vector<1x4x256xf32> to vector<1x4xf32>
    %7 = vector.shape_cast %6 : vector<1x4xf32> to vector<1x4x1xf32>
    %cst_9 = arith.constant dense<0.000000e+00> : vector<4x1xf32>
    %8 = vector.multi_reduction <add>, %7, %cst_9 [0] : vector<1x4x1xf32> to vector<4x1xf32>
    %9 = arith.mulf %1, %1 : vector<1x4x256xf32>
    %cst_10 = arith.constant dense<0.000000e+00> : vector<1x4xf32>
    %10 = vector.multi_reduction <add>, %9, %cst_10 [2] : vector<1x4x256xf32> to vector<1x4xf32>
    %11 = vector.shape_cast %10 : vector<1x4xf32> to vector<1x4x1xf32>
    %cst_11 = arith.constant dense<0.000000e+00> : vector<4x1xf32>
    %12 = vector.multi_reduction <add>, %11, %cst_11 [0] : vector<1x4x1xf32> to vector<4x1xf32>
    %cst_12 = arith.constant 3.906250e-03 : f32
    %13 = vector.broadcast %cst_12 : f32 to vector<4x1xf32>
    %14 = arith.mulf %8, %13 : vector<4x1xf32>
    %cst_13 = arith.constant 3.906250e-03 : f32
    %15 = vector.broadcast %cst_13 : f32 to vector<4x1xf32>
    %16 = arith.mulf %12, %15 : vector<4x1xf32>
    %17 = arith.mulf %14, %14 : vector<4x1xf32>
    %18 = arith.subf %16, %17 : vector<4x1xf32>
    %cst_14 = arith.constant 0.000000e+00 : f32
    %19 = vector.broadcast %cst_14 : f32 to vector<4x1xf32>
    %20 = arith.maximumf %18, %19 : vector<4x1xf32>
    %cst_15 = arith.constant 9.99999974E-6 : f32
    %21 = vector.broadcast %cst_15 : f32 to vector<4x1xf32>
    %22 = arith.addf %20, %21 : vector<4x1xf32>
    %23 = math.rsqrt %22 : vector<4x1xf32>
    %24 = arith.mulf %23, %3 : vector<4x1xf32>
    %25 = arith.mulf %14, %24 : vector<4x1xf32>
    %26 = arith.subf %5, %25 : vector<4x1xf32>
    %27 = vector.shape_cast %24 : vector<4x1xf32> to vector<1x4x1xf32>
    %28 = vector.broadcast %27 : vector<1x4x1xf32> to vector<1x4x256xf32>
    %29 = arith.mulf %1, %28 : vector<1x4x256xf32>
    %30 = vector.shape_cast %26 : vector<4x1xf32> to vector<1x4x1xf32>
    %31 = vector.broadcast %30 : vector<1x4x1xf32> to vector<1x4x256xf32>
    %32 = arith.addf %29, %31 : vector<1x4x256xf32>
    %c0_16 = arith.constant 0 : index
    %c0_17 = arith.constant 0 : index
    %c0_18 = arith.constant 0 : index
    %c0_19 = arith.constant 0 : index
    %33 = vector.load %arg4[%c0_16, %c0_17, %c0_18, %c0_19] : memref<1x1x4x256xf32, #tpu.memory_space<vmem>>, vector<1x1x4x256xf32>
    %34 = vector.shape_cast %33 : vector<1x1x4x256xf32> to vector<1x4x256xf32>
    %35 = vector.shape_cast %32 : vector<1x4x256xf32> to vector<1x1x4x256xf32>
    tpu.vector_store %arg4[%c0_16, %c0_17, %c0_18, %c0_19], %35 {strides = array<i32>} : memref<1x1x4x256xf32, #tpu.memory_space<vmem>>, vector<1x1x4x256xf32>,
    return
  }
  func.func @transform_0(%arg0: i32) -> (i32, i32, i32, i32) {
    %c0_i32 = arith.constant 0 : i32
    %c0_i32_0 = arith.constant 0 : i32
    %c0_i32_1 = arith.constant 0 : i32
    %c0_i32_2 = arith.constant 0 : i32
    return %arg0, %c0_i32, %c0_i32_0, %c0_i32_1 : i32, i32, i32, i32
  }
  func.func @transform_1(%arg0: i32) -> (i32, i32, i32) {
    %c0_i32 = arith.constant 0 : i32
    %c0_i32_0 = arith.constant 0 : i32
    %c0_i32_1 = arith.constant 0 : i32
    return %arg0, %c0_i32, %c0_i32_0 : i32, i32, i32
  }
  func.func @transform_2(%arg0: i32) -> (i32, i32, i32) {
    %c0_i32 = arith.constant 0 : i32
    %c0_i32_0 = arith.constant 0 : i32
    %c0_i32_1 = arith.constant 0 : i32
    return %arg0, %c0_i32, %c0_i32_0 : i32, i32, i32
  }
  func.func @transform_3(%arg0: i32) -> (i32, i32, i32, i32) {
    %c0_i32 = arith.constant 0 : i32
    %c0_i32_0 = arith.constant 0 : i32
    %c0_i32_1 = arith.constant 0 : i32
    %c0_i32_2 = arith.constant 0 : i32
    return %arg0, %c0_i32, %c0_i32_0, %c0_i32_1 : i32, i32, i32, i32
  }
}

</mosaic_0001>

<bundles_post_ra>
// kernel: tpu_custom_call.1
= control target key start
LH: loop header
LB: loop body
LE: loop exit
PB: predicated region body
PF: predicated region fallthrough
CT: control target
= control target key end

     0   :  { %8 = vsyncpa [#allocation3], 0  ;;  %s614_s0 = inlined_call_operand.vmem [shape: f32[2,1,4,256], index: 0, kind: input, shape index: {}]   ;;  %s615_s1 = inlined_call_operand.vmem [shape: f32[2,4,1], index: 1, kind: input, shape index: {}]   ;;  %s616_s2 = inlined_call_operand.vmem [shape: f32[2,4,1], index: 2, kind: input, shape index: {}]   ;;  %s617_s3 = inlined_call_operand.hbm [shape: f32[2,1,4,256], index: 3, kind: output, shape index: {}]  }
   0x1   :  { %10 = vsyncpa [#allocation3 + $0x1], 0  ;;  %s519_s12 = smov 0   ;;  %s521_s13 = smov 0  }
   0x2   :  { %s523_s14 = smov 0   ;;  %s525_s15 = smov 0  }
   0x3 LB: > { %s540_s16 = sadd.s32 4294967295, %s495_s15   ;;  %s372_s17 = sadd.s32 4294967294, %s495_s15   ;;  %s495_s15 = sphi %s525_s15, %s623_s15   ;;  %s491_s14 = sphi %s523_s14, %s622_s14   ;;  %s487_s13 = sphi %s521_s13, %s621_s13   ;;  %s483_s12 = sphi %s519_s12, %s620_s12  }
   0x4   : > { %s544_s18 = sadd.s32 1, %s495_s15   ;;  %s101_s19 = sadd.s32 1, %s491_s14 }
   0x5   : > { %s98_s20 = ssub.s32 %s495_s15, %s544_s18  ;;  %p111_p0 = scmp.ne.s32.totalorder %s491_s14, %s487_s13 }
   0x6   : > { %p99_p1 = scmp.eq.s32.totalorder %s98_s20, 0  ;;  %p112_p2 = scmp.eq.s32.totalorder %s540_s16, 1 }
   0x7   : > { %p117_p3 = scmp.ne.s32.totalorder %s487_s13, %s483_s12  ;;  %p118_p4 = scmp.eq.s32.totalorder %s372_s17, 1 }
   0x8   : > { %s555_s21 = scalar_select %p99_p1, %s491_s14, %s101_s19  }
   0x9   : > { %p557_p5 = por %p112_p2, %p111_p0  ;;  %p561_p6 = por %p118_p4, %p117_p3 }
   0xa   : > { %p375_p7 = scmp.ge.s32.totalorder %s495_s15, 1  ;;  %p158_p8 = scmp.lt.s32.totalorder %s495_s15, 3 }
   0xc   : > { %p159_p9 = pnand %p375_p7, %p158_p8 }
   0xd   : > { %p190_p10 = scmp.lt.s32.totalorder (!%p159_p9), %s540_s16, 1  ;;  %s187_s9 = sand.u32 (!%p159_p9), 1, %s487_s13  }
   0xe   : > { %162 = sbr.rel (%p159_p9) target bundleno = 317 (0x13d), region = 32  ;;  %s376_s10 = sshll.u32 (!%p159_p9), %s187_s9, 3 }
   0xf   : > { %s387_s11 = sshll.u32 (!%p159_p9), %s540_s16, 3  ;;  %s273_s27 = scalar_lea.sflag (!%p159_p9), [#allocation3], %s187_s9 }
  0x10   : > { %s284_s20 = scalar_lea.hbm (!%p159_p9), %s617_s3, %s387_s11  ;;  %s453_s4 = scalar_lea.hbm (!%p159_p9), %s617_s3, 16 }
  0x11   : > { %s288_s26 = sshll.u32 (!%p159_p9), %s284_s20, 4  ;;  %s289_s26 = int_to_ptr.hbm [resolvable:$true] %s288_s26 }
  0x13   : > { %s569_s24 = scalar_select %p190_p10, %s540_s16, 1  ;;  %vm212_vm0 = vcmask 1043456   ;;  %v497_v12 = vmov 0   ;;  %v498_v33 = vmov 839922192  }
  0x14   : > { %429 = vset.pattern.permute.xlu1 %v497_v12  ;;  %430 = vset.pattern.permute.xlu0 %v497_v12  ;;  %v256_v34 = vunpack.c.l.s4 %v498_v33 }
  0x15   : > { %s386_s25 = sshll.u32 %s569_s24, 3  ;;  %s379_s29 = sshll.u32 %s569_s24, 2 }
  0x16   : > { %s194_s28 = scalar_lea.vmem %s614_s0, %s386_s25  ;;  %s198_s5 = scalar_lea.vmem %s615_s1, %s379_s29  ;;  %v257_v36 = vunpack.c.0.s8 %v256_v34 }
  0x17   : > { %v203_v0 = vld [vmem:[%s194_s28] sm:$0xff]  ;;  %s202_s8 = scalar_lea.vmem %s616_s2, %s379_s29  ;;  %s189_s24 = scalar_lea.vmem [#allocation2], %s376_s10 }
  0x18   : > { %207 = vst [vmem:[#allocation1] ss:$2 sm:$0xff] %v203_v0  ;;  %v219_v1 = vmul.f32 %v203_v0, %v203_v0  ;;  %v204_v26 = vld [vmem:[%s198_s5] sm:$0xf]  ;;  %s286_s25 = sshll.u32 %s189_s24, 4  ;;  %s447_s28 = sshra.s32 %s289_s26, 4  ;;  %s287_s25 = int_to_ptr.vmem [resolvable:$true] %s286_s25  ;;  %s448_s28 = int_to_ptr.hbm [resolvable:$true] %s447_s28 }
  0x19   : > { %v205_v31 = vld [vmem:[%s202_s8] sm:$0xf]  ;;  %s449_s16 = scalar_lea.hbm %s448_s28, 8  ;;  %p454_p0 = scmp.lt.s32.totalorder %s448_s28, %s617_s3 }
  0x1a   : > { %p450_p11 = scmp.ne.s32.totalorder %s448_s28, %s449_s16  ;;  %p455_p1 = scmp.lt.s32.totalorder %s453_s4, %s449_s16 }
  0x1c   : > { %p451_p12 = pnand %p450_p11, %p557_p5  ;;  %p456_p2 = por %p455_p1, %p454_p0 }
  0x1e   : > { %p452_p13 = pneg %p451_p12 }
  0x1f   : > { %v208_v2 = vld.sshfl [vmem:[#allocation1] sm:$0xff pattern:$0x75316420]  ;;  %v209_v3 = vld.sshfl [vmem:[#allocation1 + $0x8] sm:$0xff pattern:$0x75316420] }
  0x20   : > { %v213_v4 = vsel %vm212_vm0, %v208_v2, 0.0  ;;  %v214_v5 = vsel %vm212_vm0, %v209_v3, 0.0  ;;  %221 = vst [vmem:[#allocation1] ss:$2 sm:$0xff] %v219_v1  ;;  %p457_p3 = pnand %p456_p2, %p452_p13 }
  0x21   : > { %v215_v6 = vadd.f32 %v214_v5, %v213_v4 }
  0x23   : > { %216 = vadd.xlane.f32.xlu0 %v215_v6 }
  0x27   : > { %v222_v7 = vld.sshfl [vmem:[#allocation1] sm:$0xff pattern:$0x75316420]  ;;  %v223_v8 = vld.sshfl [vmem:[#allocation1 + $0x8] sm:$0xff pattern:$0x75316420] }
  0x28   : > { %v226_v9 = vsel %vm212_vm0, %v222_v7, 0.0  ;;  %v227_v10 = vsel %vm212_vm0, %v223_v8, 0.0 }
  0x29   : > { %v228_v11 = vadd.f32 %v227_v10, %v226_v9 }
  0x2b   : > { %229 = vadd.xlane.f32.xlu0 %v228_v11 }
  0x96   : > { %v217_v13 = vpop.xlane.xlu0 %216 }
  0x97   : > { %v232_v14 = vmul.f32 0.00390625, %v217_v13 }
  0x99   : > { %v234_v16 = vmul.f32 %v232_v14, %v232_v14 }
  0x9e   : > { %v230_v15 = vpop.xlane.xlu0 %229 }
  0x9f   : > { %v233_v17 = vmul.f32 0.00390625, %v230_v15 }
  0xa1   : > { %v235_v18 = vsub.f32 %v233_v17, %v234_v16 }
  0xa3   : > { %v236_v19 = vmax.f32 %v235_v18, 0.0 }
  0xa5   : > { %v237_v20 = vadd.f32 1e-05, %v236_v19 }
  0xa7   : > { %431 = vrsqrt.f32 %v237_v20  ;;  %vm244_vm2 = vweird.f32 %v237_v20 }
  0xad   : > { %v432_v21 = vpop.eup %431 }
  0xae   : > { %v239_v22 = vmul.f32 %v432_v21, %v237_v20  ;;  %vm245_vm1 = vweird.f32 %v432_v21 }
  0xaf   : > { %vm246_vm3 = vmor %vm244_vm2, %vm245_vm1 }
  0xb0   : > { %v240_v23 = vmul.f32 %v432_v21, %v239_v22 }
  0xb2   : > { %v241_v24 = vmul.f32 0.5, %v240_v23 }
  0xb4   : > { %v242_v25 = vsub.f32 1.5, %v241_v24 }
  0xb6   : > { %v243_v27 = vmul.f32 %v432_v21, %v242_v25 }
  0xb8   : > { %v247_v28 = vsel %vm246_vm3, %v432_v21, %v243_v27 }
  0xb9   : > { %v248_v29 = vmul.f32 %v247_v28, %v204_v26 }
  0xbb   : > { %253 = vperm.xlu1 %429, %v248_v29   ;;  %v249_v30 = vmul.f32 %v248_v29, %v232_v14 }
  0xbd   : > { %v250_v32 = vsub.f32 %v205_v31, %v249_v30 }
  0xc3   : > { %263 = vperm.xlu1 %429, %v250_v32  }
 0x12d   : > { %v254_v35 = vpop.permute.xlu1 %253 }
 0x12e   : > { %v258_v37 = vperm.slane %v254_v35, %v257_v36 }
 0x130   : > { %v260_v39 = vmul.f32 %v258_v37, %v203_v0 }
 0x135   : > { %v264_v38 = vpop.permute.xlu1 %263 }
 0x136   : > { %v268_v40 = vperm.slane %v264_v38, %v257_v36 }
 0x138   : > { %v270_v41 = vadd.f32 %v268_v40, %v260_v39 }
 0x13a   : > { %271 = vst [vmem:[%s189_s24] sm:$0xff] %v270_v41 }
 0x13b   : > { %460 = shalt.err (!%p457_p3)
}
 0x13c   : > { %388 = dma.vmem_to_hbm [thread:$0]  (%p557_p5), %s287_s25, 128, %s289_s26, %s273_s27  }
 0x13d PF: > { %p394_p4 = scmp.ge.s32.totalorder %s495_s15, 2  ;;  %s300_s7 = sand.u32 1, %s483_s12  }
 0x13e   : > { %s301_s8 = scalar_lea.sflag [#allocation3], %s300_s7 }
 0x13f   : > { %p391_p7 = pnand %p394_p4, %p561_p6 }
 0x141   : > { %p392_p8 = pneg %p391_p7 }
 0x143   : > { %478 = dma.done.wait (%p392_p8), %s301_s8, 128  }
 0x144   : > { %480 = vsyncadd (%p392_p8), %s301_s8, 4294967168  ;;  %p13_p9 = scmp.ge.s32.totalorder %s544_s18, 4   ;;  %s620_s12 = smov %s487_s13 }
 0x145   : > { %s621_s13 = smov %s491_s14  ;;  %s622_s14 = smov %s555_s21 }
 0x146   : > { %s623_s15 = smov %s544_s18  ;;  %15 = sbr.rel (!%p13_p9) target bundleno = 3 (0x3), region = 73 }
 0x14b   :  { %307 = vsyncpa [#allocation3], 1 }
 0x14c   :  { %309 = vsyncpa [#allocation3 + $0x1], 1 }

</bundles_post_ra>
